<compile_context>
chip_gen: v6e
topology: v6e:2x2x1
jax: 0.10.0
libtpu: 0.0.40
codegen_flags: <defaults>
</compile_context>

<pallas_src>
from functools import partial

import jax
import jax.numpy as jnp
from jax import lax
from jax.experimental import pallas as pl
from jax.experimental.pallas import tpu as pltpu


def _normalize_p(p):
    """Coerce integer-valued p to int (integer_pow path); keep inf / true floats."""
    if p == float("inf"):
        return float("inf")
    pf = float(p)
    if pf.is_integer():
        return int(pf)
    return pf


def _choose_tiling(bc, hw, itemsize, target_block_bytes=8 * 1024 * 1024):
    """Return (row_tile, rows_grid, hw_tile, hw_grid).

    Blocks sized for ~8 MiB of input (x2 for double buffering) which fits the
    scoped-VMEM budget on v5e/v6e/v7x once vmem_limit_bytes is raised.
    """
    full_row_bytes = hw * itemsize
    rows_fit = target_block_bytes // full_row_bytes if full_row_bytes > 0 else bc

    # Case 1: the whole [BC, HW] slab fits in one block.
    if rows_fit >= bc:
        return bc, 1, hw, 1

    # Case 2: a full-HW stripe of >=128 rows fits -> tile rows only.
    if rows_fit >= 128:
        row_tile = (rows_fit // 128) * 128   # multiple of 128 => lane-dense output
        return row_tile, pl.cdiv(bc, row_tile), hw, 1

    # Case 3: HW too large for even 128 full rows -> also split the reduction
    # axis and accumulate across it (P3 pattern).  Keeps blocks pipeline-
    # friendly on v7x's 64 MiB VMEM.
    row_tile = bc if bc < 128 else 128
    lanes_fit = max(target_block_bytes // (row_tile * itemsize), 128)
    hw_tile = min(max((lanes_fit // 128) * 128, 128), hw)
    return row_tile, pl.cdiv(bc, row_tile), hw_tile, pl.cdiv(hw, hw_tile)


def _gd_kernel(x_ref, o_ref, acc_ref, *, p, p_is_inf, hw_total, hw_tile):
    # x_ref: (row_tile, hw_tile) input block
    # o_ref: (1, row_tile) lane-dense output block (constant across the hw axis)
    # acc_ref: (row_tile, 1) f32 running sum / running max
    k = pl.program_id(1)
    nk = pl.num_programs(1)

    @pl.when(k == 0)
    def _init():
        init = -jnp.inf if p_is_inf else 0.0
        acc_ref[...] = jnp.full(acc_ref.shape, init, jnp.float32)

    x = x_ref[...].astype(jnp.float32)

    ragged = (hw_total % hw_tile) != 0  # static
    if ragged:
        lane = lax.broadcasted_iota(jnp.int32, x.shape, 1)
        valid = (k * hw_tile + lane) < hw_total

    if p_is_inf:
        if ragged:
            x = jnp.where(valid, x, -jnp.inf)
        acc_ref[...] = jnp.maximum(acc_ref[...],
                                   jnp.max(x, axis=-1, keepdims=True))
    else:
        if p == 1:
            xp = x
        elif p == 2:
            xp = x * x                      # cheap VPU multiply
        else:
            xp = x ** p                     # int p -> integer_pow (VPU); float p matches torch NaN semantics
        if ragged:
            xp = jnp.where(valid, xp, 0.0)  # masked OOB lanes contribute 0 to the sum
        acc_ref[...] += jnp.sum(xp, axis=-1, keepdims=True)

    @pl.when(k == nk - 1)
    def _finalize():
        if p_is_inf:
            r = acc_ref[...]
        else:
            s = acc_ref[...] * jnp.float32(1.0 / hw_total)
            if p == 1:
                r = s
            else:
                r = jnp.sign(s) * jnp.abs(s) ** jnp.float32(1.0 / p)
        # (row_tile, 1) -> (1, row_tile): lane-dense store, single unmasked slab.
        o_ref[...] = jnp.transpose(r, (1, 0)).astype(o_ref.dtype)


def global_descriptor(x, p=1):
    """Pallas implementation of GlobalDescriptor.forward for NCHW input."""
    assert x.ndim == 4, "the input tensor of GlobalDescriptor must be [B, C, H, W]"
    B, C, H, W = x.shape
    BC, HW = B * C, H * W
    x2d = x.reshape(BC, HW)

    p = _normalize_p(p)
    p_is_inf = p == float("inf")
    itemsize = jnp.dtype(x.dtype).itemsize

    row_tile, rows_grid, hw_tile, hw_grid = _choose_tiling(BC, HW, itemsize)

    kernel = partial(_gd_kernel, p=p, p_is_inf=p_is_inf,
                     hw_total=HW, hw_tile=hw_tile)

    out = pl.pallas_call(
        kernel,
        out_shape=jax.ShapeDtypeStruct((1, rows_grid * row_tile), x.dtype),
        grid_spec=pltpu.PrefetchScalarGridSpec(
            num_scalar_prefetch=0,
            grid=(rows_grid, hw_grid),                      # reduction axis last
            in_specs=[pl.BlockSpec((row_tile, hw_tile), lambda i, k: (i, k))],
            out_specs=pl.BlockSpec((1, row_tile), lambda i, k: (0, i)),
            scratch_shapes=[pltpu.VMEM((row_tile, 1), jnp.float32)],
        ),
        compiler_params=pltpu.CompilerParams(
            dimension_semantics=("parallel", "arbitrary"),
            vmem_limit_bytes=32 * 1024 * 1024,              # room for 2x ~8 MiB blocks
        ),
        cost_estimate=pl.CostEstimate(
            flops=2 * BC * HW,
            transcendentals=0 if (p_is_inf or p == 1) else BC,
            bytes_accessed=BC * HW * itemsize + BC * itemsize,
        ),
    )(x2d)

    # Drop lane padding from ragged row blocks, restore [B, C].
    return out[0, :BC].reshape(B, C)


def _reference(x, p):
    # Pure-JAX reference matching the PyTorch semantics.
    p = _normalize_p(p)
    if p == float("inf"):
        return jnp.max(x, axis=(-1, -2))
    xf = x.astype(jnp.float32)
    s = jnp.mean(xf ** p, axis=(-1, -2))
    if p != 1:
        s = jnp.sign(s) * jnp.abs(s) ** (1.0 / p)
    return s.astype(x.dtype)


if __name__ == "__main__":
    key = jax.random.PRNGKey(0)
    B, C, H, W = 2, 4, 16, 16
    x = jax.random.normal(key, (B, C, H, W), dtype=jnp.float32)

    ok = True
    for p in (1, 2, 3, 3.0, float("inf")):
        out = jax.block_until_ready(global_descriptor(x, p=p))
        ref = _reference(x, p)
        ok &= out.shape == (B, C)
        ok &= bool(jnp.allclose(out, ref, atol=1e-4, rtol=1e-4))

    # Also exercise a shape whose B*C is not a multiple of 8 (full-extent rows).
    x2 = jax.random.normal(jax.random.PRNGKey(1), (3, 5, 7, 7), dtype=jnp.float32)
    out2 = jax.block_until_ready(global_descriptor(x2, p=3))
    ok &= bool(jnp.allclose(out2, _reference(x2, 3), atol=1e-4, rtol=1e-4))

    if ok:
        print("KERNEL_OK")
</pallas_src>

<mosaic_0001>
module attributes {stable_mosaic.version = 11 : i64} {
  func.func @_gd_kernel(%arg0: i32, %arg1: i32, %arg2: memref<8x256xf32, #tpu.memory_space<vmem>>, %arg3: memref<1x8xf32, #tpu.memory_space<vmem>>, %arg4: memref<8x1xf32, #tpu.memory_space<vmem>>) attributes {dimension_semantics = [#tpu.dimension_semantics<parallel>, #tpu.dimension_semantics<arbitrary>], iteration_bounds = array<i64: 1, 1>, scalar_prefetch = 0 : i64, scratch_operands = 1 : i64, tpu.core_type = #tpu.core_type<tc>, window_params = [{transform_indices = @transform_0, window_bounds = array<i64: 8, 256>}, {transform_indices = @transform_1, window_bounds = array<i64: 1, 8>}]} {
    %c0_i32 = arith.constant 0 : i32
    %0 = arith.cmpi eq, %arg1, %c0_i32 : i32
    %1 = arith.extui %0 : i1 to i32
    %c0_i32_0 = arith.constant 0 : i32
    %2 = arith.cmpi ne, %1, %c0_i32_0 : i32
    scf.if %2 {
      %cst_8 = arith.constant 0.000000e+00 : f32
      %12 = vector.broadcast %cst_8 : f32 to vector<8x1xf32>
      %c0_9 = arith.constant 0 : index
      %c0_10 = arith.constant 0 : index
      %13 = vector.load %arg4[%c0_9, %c0_10] : memref<8x1xf32, #tpu.memory_space<vmem>>, vector<8x1xf32>
      tpu.vector_store %arg4[%c0_9, %c0_10], %12 {strides = array<i32>} : memref<8x1xf32, #tpu.memory_space<vmem>>, vector<8x1xf32>,
    } else {
    }
    %c0 = arith.constant 0 : index
    %c0_1 = arith.constant 0 : index
    %3 = vector.load %arg2[%c0, %c0_1] : memref<8x256xf32, #tpu.memory_space<vmem>>, vector<8x256xf32>
    %c0_2 = arith.constant 0 : index
    %c0_3 = arith.constant 0 : index
    %4 = vector.load %arg4[%c0_2, %c0_3] : memref<8x1xf32, #tpu.memory_space<vmem>>, vector<8x1xf32>
    %cst = arith.constant dense<0.000000e+00> : vector<8xf32>
    %5 = vector.multi_reduction <add>, %3, %cst [1] : vector<8x256xf32> to vector<8xf32>
    %6 = vector.shape_cast %5 : vector<8xf32> to vector<8x1xf32>
    %7 = arith.addf %4, %6 : vector<8x1xf32>
    %c0_4 = arith.constant 0 : index
    %c0_5 = arith.constant 0 : index
    %8 = vector.load %arg4[%c0_4, %c0_5] : memref<8x1xf32, #tpu.memory_space<vmem>>, vector<8x1xf32>
    tpu.vector_store %arg4[%c0_4, %c0_5], %7 {strides = array<i32>} : memref<8x1xf32, #tpu.memory_space<vmem>>, vector<8x1xf32>,
    %c0_i32_6 = arith.constant 0 : i32
    %9 = arith.cmpi eq, %arg1, %c0_i32_6 : i32
    %10 = arith.extui %9 : i1 to i32
    %c0_i32_7 = arith.constant 0 : i32
    %11 = arith.cmpi ne, %10, %c0_i32_7 : i32
    scf.if %11 {
      %c0_8 = arith.constant 0 : index
      %c0_9 = arith.constant 0 : index
      %12 = vector.load %arg4[%c0_8, %c0_9] : memref<8x1xf32, #tpu.memory_space<vmem>>, vector<8x1xf32>
      %cst_10 = arith.constant 3.906250e-03 : f32
      %13 = vector.broadcast %cst_10 : f32 to vector<8x1xf32>
      %14 = arith.mulf %12, %13 : vector<8x1xf32>
      %15 = tpu.transpose %14, [1, 0] : vector<8x1xf32> -> vector<1x8xf32>
      %c0_11 = arith.constant 0 : index
      %c0_12 = arith.constant 0 : index
      %16 = vector.load %arg3[%c0_11, %c0_12] : memref<1x8xf32, #tpu.memory_space<vmem>>, vector<1x8xf32>
      tpu.vector_store %arg3[%c0_11, %c0_12], %15 {strides = array<i32>} : memref<1x8xf32, #tpu.memory_space<vmem>>, vector<1x8xf32>,
    } else {
    }
    return
  }
  func.func @transform_0(%arg0: i32, %arg1: i32) -> (i32, i32) {
    %c0_i32 = arith.constant 0 : i32
    return %arg0, %arg1 : i32, i32
  }
  func.func @transform_1(%arg0: i32, %arg1: i32) -> (i32, i32) {
    %c0_i32 = arith.constant 0 : i32
    %c0_i32_0 = arith.constant 0 : i32
    return %c0_i32, %arg0 : i32, i32
  }
}

</mosaic_0001>

<bundles_post_ra>
// kernel: tpu_custom_call.1
= control target key start
LH: loop header
LB: loop body
LE: loop exit
PB: predicated region body
PF: predicated region fallthrough
CT: control target
= control target key end

     0   :  { %6 = vsyncpa [#allocation4], 0  ;;  %s156_s0 = inlined_call_operand.hbm [shape: f32[8,256], index: 0, kind: input, shape index: {}]   ;;  %s157_s1 = inlined_call_operand.hbm [shape: f32[1,8], index: 1, kind: output, shape index: {}]  }
   0x1   :  { %7 = vsyncpa [#allocation5], 0  ;;  %s137_s6 = smov [#allocation3]  }
   0x2   :  { %s14_s7 = sshll.u32 %s137_s6, 4  ;;  %s15_s7 = int_to_ptr.vmem [resolvable:$true] %s14_s7 }
   0x3   :  { %s101_s8 = scalar_lea.vmem %s15_s7, 256  ;;  %p106_p1 = scmp.lt.s32.totalorder %s15_s7, %s15_s7 }
   0x4   :  { %p102_p0 = scmp.ne.s32.totalorder %s15_s7, %s101_s8  ;;  %p107_p2 = scmp.lt.s32.totalorder %s101_s8, %s101_s8 }
   0x6   :  { %p108_p3 = por %p107_p2, %p106_p1 }
   0x8   :  { %p109_p4 = pnand %p108_p3, %p102_p0 }
   0xa   :  { %112 = shalt.err (!%p109_p4)
}
   0xb   :  { %17 = dma.hbm_to_vmem [thread:$0]  %s156_s0, 256, %s15_s7, [#allocation4]  }
   0xc   :  { %133 = dma.done.wait [#allocation4], 256  }
   0xd   :  { %134 = vsyncadd [#allocation4], 4294967040  ;;  %vm25_vm0 = vcmask 7168   ;;  %v138_v0 = vmov 0.0   ;;  %v27_v1 = vld [vmem:[#allocation3] sm:$0xff]  ;;  %v28_v2 = vld [vmem:[#allocation3 + $0x8] sm:$0xff] }
   0xe   :  { %26 = vst.msk [vmem:[#allocation2] sm:$0xff] %vm25_vm0, %v138_v0  ;;  %v30_v3 = vadd.f32 %v28_v2, %v27_v1  ;;  %s139_s11 = smov [#allocation6]   ;;  %vm73_vm1 = vcmask 57344  }
   0xf   :  { %s81_s12 = sshll.u32 %s139_s11, 4  ;;  %s82_s12 = int_to_ptr.vmem [resolvable:$true] %s81_s12 }
  0x10   :  { %31 = vadd.xlane.f32.xlu0 %v30_v3  ;;  %s113_s0 = scalar_lea.vmem %s82_s12, 16  ;;  %s117_s13 = scalar_lea.vmem %s82_s12, 32 }
  0x11   :  { %p114_p5 = scmp.ne.s32.totalorder %s82_s12, %s113_s0  ;;  %p118_p6 = scmp.lt.s32.totalorder %s82_s12, %s82_s12 }
  0x12   :  { %p119_p7 = scmp.lt.s32.totalorder %s117_s13, %s113_s0 }
  0x14   :  { %p120_p8 = por %p119_p7, %p118_p6 }
  0x15   :  { %v29_v4 = vld [vmem:[#allocation2] sm:$0xff] }
  0x16   :  { %p121_p9 = pnand %p120_p8, %p114_p5 }
  0x99   :  { %v32_v5 = vpop.xlane.xlu0 %31 }
  0x9a   :  { %v33_v6 = vadd.f32 %v32_v5, %v29_v4 }
  0x9c   :  { %35 = vst.msk [vmem:[#allocation2] sm:$0xff] %vm25_vm0, %v33_v6 }
  0xa3   :  { %v39_v7 = vld [vmem:[#allocation2] sm:$0xff] }
  0xa4   :  { %v40_v8 = vmul.f32 0.00390625, %v39_v7 }
  0xa6   :  { %41 = vxpose.xlu0.b32.start.end [1/1] (short) (narrow) %v40_v8, 8 }
 0x122   :  { %v57_v9 = vpop.trf.xlu0 }
 0x123   :  { %74 = vst.msk [vmem:[#allocation6] sm:$0x1] %vm73_vm1, %v57_v9 }
 0x124   :  { %124 = shalt.err (!%p121_p9)
}
 0x125   :  { %84 = dma.vmem_to_hbm [thread:$0]  %s82_s12, 16, %s157_s1, [#allocation5]  }
 0x126   :  { %135 = dma.done.wait [#allocation5], 16  }
 0x127   :  { %136 = vsyncadd [#allocation5], 4294967280 }
 0x128   :  { %88 = vsyncpa [#allocation4], 1 }
 0x129   :  { %89 = vsyncpa [#allocation5], 1 }

</bundles_post_ra>
